<compile_context>
chip_gen: v7x
topology: tpu7x:2x2x1
jax: 0.10.0
libtpu: 0.0.40
codegen_flags: <defaults>
</compile_context>

<pallas_src>
import functools

import jax
import jax.numpy as jnp
from jax.experimental import pallas as pl
from jax.experimental.pallas import tpu as pltpu

LANES = 128


def _ce_kernel(logits_ref, labels_ref, out_ref, acc_ref, *, hw, tpc):
    """Per-tile cross-entropy partial sums.

    logits_ref: (1, C, th, 128) float   (input dtype, cast per-slab)
    labels_ref: (1, th, 128)    int32
    out_ref:    (1, 1, 1, 128)  f32     per-(sample, chunk) lane partials
    acc_ref:    (th, 128)       f32     VMEM scratch accumulator
    """
    t = pl.program_id(2)
    C = logits_ref.shape[1]
    th = acc_ref.shape[0]

    @pl.when(t == 0)
    def _():
        acc_ref[...] = jnp.zeros_like(acc_ref)

    # Logical (global) tile index for this chunk-local step.  For the clamped
    # duplicate block at the tail of an odd tile count this exceeds the real
    # tile range, so every pixel below is masked out (contributes 0).
    tile = pl.program_id(1) * tpc + t
    row0 = tile * th
    row_i = jax.lax.broadcasted_iota(jnp.int32, (th, LANES), 0)
    lane_i = jax.lax.broadcasted_iota(jnp.int32, (th, LANES), 1)
    pix = (row0 + row_i) * LANES + lane_i
    valid = pix < hw                                     # (th, 128) bool

    y = labels_ref[0]                                    # (th, 128) int32

    # Pass 1 over classes: running max fused with the target-logit select.
    # Per-channel slab reads keep vreg pressure bounded and avoid a whole-tile
    # f32 copy (bf16 inputs stay narrow in VMEM).
    x0 = logits_ref[0, 0].astype(jnp.float32)            # (th, 128)
    m = x0
    picked = jnp.where(y == 0, x0, 0.0)
    for c in range(1, C):
        xc = logits_ref[0, c].astype(jnp.float32)
        m = jnp.maximum(m, xc)
        picked = picked + jnp.where(y == c, xc, 0.0)

    # Pass 2 over classes: sum of exp(x - max)  (EUP exp, f32 accumulation).
    se = jnp.zeros((th, LANES), jnp.float32)
    for c in range(C):
        xc = logits_ref[0, c].astype(jnp.float32)
        se = se + jnp.exp(xc - m)

    lse = m + jnp.log(se)                                # (th, 128)
    acc_ref[...] += jnp.where(valid, lse - picked, 0.0)

    @pl.when(t == tpc - 1)
    def _():
        # Single sublane (XLU) reduce -> lane-dense 128-wide output block.
        out_ref[...] = jnp.sum(acc_ref[...], axis=0).reshape(1, 1, 1, LANES)


def _plan_tile(hw, n_classes, itemsize, vmem_budget):
    """Pick th (sublane rows per tile).  Returns (th, s) with s = rows/plane.

    Per-row VMEM bytes: double-buffered logits + double-buffered int32 labels
    + f32 accumulator + ~8 f32 rows of headroom for Mosaic temporaries
    (max / picked / exp-sum / iota masks).
    """
    s = pl.cdiv(hw, LANES)
    row_bytes = LANES * (2 * n_classes * itemsize + 2 * 4 + 4 + 8 * 4)
    max_th = max(8, (vmem_budget // row_bytes) // 8 * 8)
    th = s if s <= max_th else max_th
    return th, s


def cross_entropy_pallas(logits, labels, vmem_budget_bytes=20 << 20):
    """logits: (N, C, HW) float, labels: (N, HW) int -> scalar mean CE."""
    N, C, HW = logits.shape
    if labels.dtype != jnp.int32:
        labels = labels.astype(jnp.int32)

    th, s = _plan_tile(HW, C, jnp.dtype(logits.dtype).itemsize,
                       vmem_budget_bytes)
    hw_pad = s * LANES
    if hw_pad != HW:
        # Lane-remainder pad only (HW % 128 != 0), needed for the (s, 128)
        # view.  No pad to a multiple of th*128: edge blocks are masked
        # in-kernel via the pixel-index iota.
        logits = jnp.pad(logits, ((0, 0), (0, 0), (0, hw_pad - HW)))
        labels = jnp.pad(labels, ((0, 0), (0, hw_pad - HW)))

    logits4 = logits.reshape(N, C, s, LANES)     # free view (row-major)
    labels3 = labels.reshape(N, s, LANES)        # free view (row-major)

    n_tiles = pl.cdiv(s, th)
    # Split the reduction axis into 2 parallel chunks so both v7x TensorCores
    # are busy even when N == 1 (harmless on single-TC v5e/v6e).
    n_chunks = 2 if n_tiles >= 2 else 1
    tpc = pl.cdiv(n_tiles, n_chunks)

    # Clamp the logical tile index into range; the duplicate block read by the
    # tail step of an odd tile count is fully masked inside the kernel.
    def logits_map(n, c, t):
        return (n, 0, jnp.minimum(c * tpc + t, n_tiles - 1), 0)

    def labels_map(n, c, t):
        return (n, jnp.minimum(c * tpc + t, n_tiles - 1), 0)

    kernel = functools.partial(_ce_kernel, hw=HW, tpc=tpc)

    partials = pl.pallas_call(
        kernel,
        out_shape=jax.ShapeDtypeStruct((N, n_chunks, 1, LANES), jnp.float32),
        grid_spec=pltpu.PrefetchScalarGridSpec(
            num_scalar_prefetch=0,
            grid=(N, n_chunks, tpc),
            in_specs=[
                pl.BlockSpec((1, C, th, LANES), logits_map),
                pl.BlockSpec((1, th, LANES), labels_map),
            ],
            out_specs=pl.BlockSpec((1, 1, 1, LANES),
                                   lambda n, c, t: (n, c, 0, 0)),
            scratch_shapes=[pltpu.VMEM((th, LANES), jnp.float32)],
        ),
        compiler_params=pltpu.CompilerParams(
            dimension_semantics=("parallel", "parallel", "arbitrary"),
            vmem_limit_bytes=32 << 20),
    )(logits4, labels3)

    # Single tiny cross-lane reduce outside the kernel.
    return jnp.sum(partials) / jnp.float32(N * HW)


class Loss:
    """JAX/Pallas port of Loss(args) with args.loss_str='ce', args.type!='post'."""

    def __init__(self, loss_str="ce", post=False):
        assert loss_str == "ce" and not post, (
            "only the loss_str='ce', non-post configuration is implemented")
        self.loss_str = loss_str
        self.post = post

    def __call__(self, y_pred, y_true):
        # y_pred: (N, C, H, W) float logits (NCHW, as in PyTorch)
        # y_true: (N, H, W) integer class indices
        N, C, H, W = y_pred.shape
        # NCHW is already channels-first per sample: free reshape, no transpose.
        logits = y_pred.reshape(N, C, H * W)
        labels = y_true.reshape(N, H * W)          # y_true.long() handled inside
        return cross_entropy_pallas(logits, labels)


if __name__ == "__main__":
    key = jax.random.PRNGKey(0)
    k1, k2, k3, k4 = jax.random.split(key, 4)

    # --- Test 1: module configuration, (N, C, H, W) = (2, 4, 16, 16) ---
    N, C, H, W = 2, 4, 16, 16
    y_pred = jax.random.normal(k1, (N, C, H, W), dtype=jnp.float32)
    y_true = jax.random.randint(k2, (N, H, W), 0, C, dtype=jnp.int32)

    loss_fn = Loss(loss_str="ce", post=False)
    out = loss_fn(y_pred, y_true)
    jax.block_until_ready(out)

    logp = jax.nn.log_softmax(jnp.transpose(y_pred, (0, 2, 3, 1)), axis=-1)
    ref = -jnp.mean(jnp.take_along_axis(logp, y_true[..., None], axis=-1))
    assert jnp.allclose(out, ref, atol=1e-5, rtol=1e-5), (out, ref)

    # --- Test 2: edge blocks (HW % 128 != 0), multi-tile reduction, odd tile
    # count with the 2-chunk parallel split, N == 1 (small budget forces th=8).
    N2, C2, H2, W2 = 1, 3, 47, 47
    y_pred2 = jax.random.normal(k3, (N2, C2, H2, W2), dtype=jnp.float32)
    y_true2 = jax.random.randint(k4, (N2, H2, W2), 0, C2, dtype=jnp.int32)

    out2 = cross_entropy_pallas(
        y_pred2.reshape(N2, C2, H2 * W2),
        y_true2.reshape(N2, H2 * W2),
        vmem_budget_bytes=40_000)
    jax.block_until_ready(out2)

    logp2 = jax.nn.log_softmax(jnp.transpose(y_pred2, (0, 2, 3, 1)), axis=-1)
    ref2 = -jnp.mean(jnp.take_along_axis(logp2, y_true2[..., None], axis=-1))
    assert jnp.allclose(out2, ref2, atol=1e-5, rtol=1e-5), (out2, ref2)

    print("KERNEL_OK")
</pallas_src>

<mosaic_0001>
module attributes {stable_mosaic.version = 11 : i64} {
  func.func @_ce_kernel(%arg0: i32, %arg1: i32, %arg2: i32, %arg3: memref<1x4x2x128xf32, #tpu.memory_space<vmem>>, %arg4: memref<1x2x128xi32, #tpu.memory_space<vmem>>, %arg5: memref<1x1x1x128xf32, #tpu.memory_space<vmem>>, %arg6: memref<2x128xf32, #tpu.memory_space<vmem>>) attributes {dimension_semantics = [#tpu.dimension_semantics<parallel>, #tpu.dimension_semantics<parallel>, #tpu.dimension_semantics<arbitrary>], iteration_bounds = array<i64: 2, 1, 1>, scalar_prefetch = 0 : i64, scratch_operands = 1 : i64, tpu.core_type = #tpu.core_type<tc>, window_params = [{transform_indices = @transform_0, window_bounds = array<i64: 1, 4, 2, 128>}, {transform_indices = @transform_1, window_bounds = array<i64: 1, 2, 128>}, {transform_indices = @transform_2, window_bounds = array<i64: 1, 1, 1, 128>}]} {
    %c0_i32 = arith.constant 0 : i32
    %0 = arith.cmpi eq, %arg2, %c0_i32 : i32
    %1 = arith.extui %0 : i1 to i32
    %c0_i32_0 = arith.constant 0 : i32
    %2 = arith.cmpi ne, %1, %c0_i32_0 : i32
    scf.if %2 {
      %cst_46 = arith.constant 0.000000e+00 : f32
      %79 = vector.broadcast %cst_46 : f32 to vector<2x128xf32>
      %c0_47 = arith.constant 0 : index
      %c0_48 = arith.constant 0 : index
      %80 = vector.load %arg6[%c0_47, %c0_48] : memref<2x128xf32, #tpu.memory_space<vmem>>, vector<2x128xf32>
      tpu.vector_store %arg6[%c0_47, %c0_48], %79 {strides = array<i32>} : memref<2x128xf32, #tpu.memory_space<vmem>>, vector<2x128xf32>,
    } else {
    }
    %c1_i32 = arith.constant 1 : i32
    %3 = arith.muli %arg1, %c1_i32 : i32
    %4 = arith.addi %3, %arg2 : i32
    %c2_i32 = arith.constant 2 : i32
    %5 = arith.muli %4, %c2_i32 : i32
    %6 = tpu.iota {dimensions = array<i32: 0>} : vector<2x128xi32>
    %7 = tpu.iota {dimensions = array<i32: 1>} : vector<2x128xi32>
    %8 = vector.broadcast %5 : i32 to vector<2x128xi32>
    %9 = arith.addi %8, %6 : vector<2x128xi32>
    %c128_i32 = arith.constant 128 : i32
    %10 = vector.broadcast %c128_i32 : i32 to vector<2x128xi32>
    %11 = arith.muli %9, %10 : vector<2x128xi32>
    %12 = arith.addi %11, %7 : vector<2x128xi32>
    %c256_i32 = arith.constant 256 : i32
    %13 = vector.broadcast %c256_i32 : i32 to vector<2x128xi32>
    %14 = arith.cmpi slt, %12, %13 : vector<2x128xi32>
    %c0 = arith.constant 0 : index
    %c0_1 = arith.constant 0 : index
    %c0_2 = arith.constant 0 : index
    %15 = vector.load %arg4[%c0, %c0_1, %c0_2] : memref<1x2x128xi32, #tpu.memory_space<vmem>>, vector<1x2x128xi32>
    %16 = vector.shape_cast %15 : vector<1x2x128xi32> to vector<2x128xi32>
    %c0_3 = arith.constant 0 : index
    %c0_4 = arith.constant 0 : index
    %c0_5 = arith.constant 0 : index
    %c0_6 = arith.constant 0 : index
    %17 = vector.load %arg3[%c0_3, %c0_4, %c0_5, %c0_6] : memref<1x4x2x128xf32, #tpu.memory_space<vmem>>, vector<1x1x2x128xf32>
    %18 = vector.shape_cast %17 : vector<1x1x2x128xf32> to vector<2x128xf32>
    %c0_i32_7 = arith.constant 0 : i32
    %19 = vector.broadcast %c0_i32_7 : i32 to vector<2x128xi32>
    %20 = arith.cmpi eq, %16, %19 : vector<2x128xi32>
    %cst = arith.constant 0.000000e+00 : f32
    %21 = vector.broadcast %cst : f32 to vector<2x128xf32>
    %22 = arith.select %20, %18, %21 : vector<2x128xi1>, vector<2x128xf32>
    %c0_8 = arith.constant 0 : index
    %c1 = arith.constant 1 : index
    %c0_9 = arith.constant 0 : index
    %c0_10 = arith.constant 0 : index
    %23 = vector.load %arg3[%c0_8, %c1, %c0_9, %c0_10] : memref<1x4x2x128xf32, #tpu.memory_space<vmem>>, vector<1x1x2x128xf32>
    %24 = vector.shape_cast %23 : vector<1x1x2x128xf32> to vector<2x128xf32>
    %25 = arith.maximumf %18, %24 : vector<2x128xf32>
    %c1_i32_11 = arith.constant 1 : i32
    %26 = vector.broadcast %c1_i32_11 : i32 to vector<2x128xi32>
    %27 = arith.cmpi eq, %16, %26 : vector<2x128xi32>
    %cst_12 = arith.constant 0.000000e+00 : f32
    %28 = vector.broadcast %cst_12 : f32 to vector<2x128xf32>
    %29 = arith.select %27, %24, %28 : vector<2x128xi1>, vector<2x128xf32>
    %30 = arith.addf %22, %29 : vector<2x128xf32>
    %c0_13 = arith.constant 0 : index
    %c2 = arith.constant 2 : index
    %c0_14 = arith.constant 0 : index
    %c0_15 = arith.constant 0 : index
    %31 = vector.load %arg3[%c0_13, %c2, %c0_14, %c0_15] : memref<1x4x2x128xf32, #tpu.memory_space<vmem>>, vector<1x1x2x128xf32>
    %32 = vector.shape_cast %31 : vector<1x1x2x128xf32> to vector<2x128xf32>
    %33 = arith.maximumf %25, %32 : vector<2x128xf32>
    %c2_i32_16 = arith.constant 2 : i32
    %34 = vector.broadcast %c2_i32_16 : i32 to vector<2x128xi32>
    %35 = arith.cmpi eq, %16, %34 : vector<2x128xi32>
    %cst_17 = arith.constant 0.000000e+00 : f32
    %36 = vector.broadcast %cst_17 : f32 to vector<2x128xf32>
    %37 = arith.select %35, %32, %36 : vector<2x128xi1>, vector<2x128xf32>
    %38 = arith.addf %30, %37 : vector<2x128xf32>
    %c0_18 = arith.constant 0 : index
    %c3 = arith.constant 3 : index
    %c0_19 = arith.constant 0 : index
    %c0_20 = arith.constant 0 : index
    %39 = vector.load %arg3[%c0_18, %c3, %c0_19, %c0_20] : memref<1x4x2x128xf32, #tpu.memory_space<vmem>>, vector<1x1x2x128xf32>
    %40 = vector.shape_cast %39 : vector<1x1x2x128xf32> to vector<2x128xf32>
    %41 = arith.maximumf %33, %40 : vector<2x128xf32>
    %c3_i32 = arith.constant 3 : i32
    %42 = vector.broadcast %c3_i32 : i32 to vector<2x128xi32>
    %43 = arith.cmpi eq, %16, %42 : vector<2x128xi32>
    %cst_21 = arith.constant 0.000000e+00 : f32
    %44 = vector.broadcast %cst_21 : f32 to vector<2x128xf32>
    %45 = arith.select %43, %40, %44 : vector<2x128xi1>, vector<2x128xf32>
    %46 = arith.addf %38, %45 : vector<2x128xf32>
    %cst_22 = arith.constant 0.000000e+00 : f32
    %47 = vector.broadcast %cst_22 : f32 to vector<2x128xf32>
    %c0_23 = arith.constant 0 : index
    %c0_24 = arith.constant 0 : index
    %c0_25 = arith.constant 0 : index
    %c0_26 = arith.constant 0 : index
    %48 = vector.load %arg3[%c0_23, %c0_24, %c0_25, %c0_26] : memref<1x4x2x128xf32, #tpu.memory_space<vmem>>, vector<1x1x2x128xf32>
    %49 = vector.shape_cast %48 : vector<1x1x2x128xf32> to vector<2x128xf32>
    %50 = arith.subf %49, %41 : vector<2x128xf32>
    %51 = math.exp %50 : vector<2x128xf32>
    %52 = arith.addf %47, %51 : vector<2x128xf32>
    %c0_27 = arith.constant 0 : index
    %c1_28 = arith.constant 1 : index
    %c0_29 = arith.constant 0 : index
    %c0_30 = arith.constant 0 : index
    %53 = vector.load %arg3[%c0_27, %c1_28, %c0_29, %c0_30] : memref<1x4x2x128xf32, #tpu.memory_space<vmem>>, vector<1x1x2x128xf32>
    %54 = vector.shape_cast %53 : vector<1x1x2x128xf32> to vector<2x128xf32>
    %55 = arith.subf %54, %41 : vector<2x128xf32>
    %56 = math.exp %55 : vector<2x128xf32>
    %57 = arith.addf %52, %56 : vector<2x128xf32>
    %c0_31 = arith.constant 0 : index
    %c2_32 = arith.constant 2 : index
    %c0_33 = arith.constant 0 : index
    %c0_34 = arith.constant 0 : index
    %58 = vector.load %arg3[%c0_31, %c2_32, %c0_33, %c0_34] : memref<1x4x2x128xf32, #tpu.memory_space<vmem>>, vector<1x1x2x128xf32>
    %59 = vector.shape_cast %58 : vector<1x1x2x128xf32> to vector<2x128xf32>
    %60 = arith.subf %59, %41 : vector<2x128xf32>
    %61 = math.exp %60 : vector<2x128xf32>
    %62 = arith.addf %57, %61 : vector<2x128xf32>
    %c0_35 = arith.constant 0 : index
    %c3_36 = arith.constant 3 : index
    %c0_37 = arith.constant 0 : index
    %c0_38 = arith.constant 0 : index
    %63 = vector.load %arg3[%c0_35, %c3_36, %c0_37, %c0_38] : memref<1x4x2x128xf32, #tpu.memory_space<vmem>>, vector<1x1x2x128xf32>
    %64 = vector.shape_cast %63 : vector<1x1x2x128xf32> to vector<2x128xf32>
    %65 = arith.subf %64, %41 : vector<2x128xf32>
    %66 = math.exp %65 : vector<2x128xf32>
    %67 = arith.addf %62, %66 : vector<2x128xf32>
    %68 = math.log %67 : vector<2x128xf32>
    %69 = arith.addf %41, %68 : vector<2x128xf32>
    %c0_39 = arith.constant 0 : index
    %c0_40 = arith.constant 0 : index
    %70 = vector.load %arg6[%c0_39, %c0_40] : memref<2x128xf32, #tpu.memory_space<vmem>>, vector<2x128xf32>
    %71 = arith.subf %69, %46 : vector<2x128xf32>
    %cst_41 = arith.constant 0.000000e+00 : f32
    %72 = vector.broadcast %cst_41 : f32 to vector<2x128xf32>
    %73 = arith.select %14, %71, %72 : vector<2x128xi1>, vector<2x128xf32>
    %74 = arith.addf %70, %73 : vector<2x128xf32>
    %c0_42 = arith.constant 0 : index
    %c0_43 = arith.constant 0 : index
    %75 = vector.load %arg6[%c0_42, %c0_43] : memref<2x128xf32, #tpu.memory_space<vmem>>, vector<2x128xf32>
    tpu.vector_store %arg6[%c0_42, %c0_43], %74 {strides = array<i32>} : memref<2x128xf32, #tpu.memory_space<vmem>>, vector<2x128xf32>,
    %c0_i32_44 = arith.constant 0 : i32
    %76 = arith.cmpi eq, %arg2, %c0_i32_44 : i32
    %77 = arith.extui %76 : i1 to i32
    %c0_i32_45 = arith.constant 0 : i32
    %78 = arith.cmpi ne, %77, %c0_i32_45 : i32
    scf.if %78 {
      %c0_46 = arith.constant 0 : index
      %c0_47 = arith.constant 0 : index
      %79 = vector.load %arg6[%c0_46, %c0_47] : memref<2x128xf32, #tpu.memory_space<vmem>>, vector<2x128xf32>
      %cst_48 = arith.constant dense<0.000000e+00> : vector<128xf32>
      %80 = vector.multi_reduction <add>, %79, %cst_48 [0] : vector<2x128xf32> to vector<128xf32>
      %81 = vector.shape_cast %80 : vector<128xf32> to vector<1x1x1x128xf32>
      %c0_49 = arith.constant 0 : index
      %c0_50 = arith.constant 0 : index
      %c0_51 = arith.constant 0 : index
      %c0_52 = arith.constant 0 : index
      %82 = vector.load %arg5[%c0_49, %c0_50, %c0_51, %c0_52] : memref<1x1x1x128xf32, #tpu.memory_space<vmem>>, vector<1x1x1x128xf32>
      tpu.vector_store %arg5[%c0_49, %c0_50, %c0_51, %c0_52], %81 {strides = array<i32>} : memref<1x1x1x128xf32, #tpu.memory_space<vmem>>, vector<1x1x1x128xf32>,
    } else {
    }
    return
  }
  func.func @transform_0(%arg0: i32, %arg1: i32, %arg2: i32) -> (i32, i32, i32, i32) {
    %c1_i32 = arith.constant 1 : i32
    %0 = arith.muli %arg1, %c1_i32 : i32
    %1 = arith.addi %0, %arg2 : i32
    %c0_i32 = arith.constant 0 : i32
    %2 = arith.minsi %1, %c0_i32 : i32
    %c0_i32_0 = arith.constant 0 : i32
    %c0_i32_1 = arith.constant 0 : i32
    %c0_i32_2 = arith.constant 0 : i32
    return %arg0, %c0_i32_0, %2, %c0_i32_1 : i32, i32, i32, i32
  }
  func.func @transform_1(%arg0: i32, %arg1: i32, %arg2: i32) -> (i32, i32, i32) {
    %c1_i32 = arith.constant 1 : i32
    %0 = arith.muli %arg1, %c1_i32 : i32
    %1 = arith.addi %0, %arg2 : i32
    %c0_i32 = arith.constant 0 : i32
    %2 = arith.minsi %1, %c0_i32 : i32
    %c0_i32_0 = arith.constant 0 : i32
    %c0_i32_1 = arith.constant 0 : i32
    return %arg0, %2, %c0_i32_0 : i32, i32, i32
  }
  func.func @transform_2(%arg0: i32, %arg1: i32, %arg2: i32) -> (i32, i32, i32, i32) {
    %c0_i32 = arith.constant 0 : i32
    %c0_i32_0 = arith.constant 0 : i32
    %c0_i32_1 = arith.constant 0 : i32
    return %arg0, %arg1, %c0_i32, %c0_i32_0 : i32, i32, i32, i32
  }
}

</mosaic_0001>

<bundles_post_ra>
// kernel: tpu_custom_call.1
= control target key start
LH: loop header
LB: loop body
LE: loop exit
PB: predicated region body
PF: predicated region fallthrough
CT: control target
= control target key end

     0   :  { %7 = vsyncpa [#allocation4], 0  ;;  %s926_s0 = inlined_call_operand.hbm [shape: f32[2,4,2,128], index: 0, kind: input, shape index: {}]   ;;  %s927_s1 = inlined_call_operand.hbm [shape: s32[2,2,128], index: 1, kind: input, shape index: {}]   ;;  %s928_s2 = inlined_call_operand.hbm [shape: f32[2,1,1,128], index: 2, kind: output, shape index: {}]  }
   0x1   :  { %9 = vsyncpa [#allocation4 + $0x1], 0 }
   0x2   :  { %10 = vsyncpa [#allocation7], 0 }
   0x3   :  { %12 = vsyncpa [#allocation7 + $0x1], 0 }
   0x4   :  { %13 = vsyncpa [#allocation5], 0 }
   0x5   :  { %15 = vsyncpa [#allocation5 + $0x1], 0  ;;  %s710_s9 = smov 0   ;;  %s712_s10 = smov 0  }
   0x6   :  { %s714_s11 = smov 0   ;;  %s716_s12 = smov 0  }
   0x7   :  { %s718_s13 = smov 0   ;;  %s720_s14 = smov 0  }
   0x8 LB: > { %s442_s15 = sadd.s32 4294967295, %s687_s14   ;;  %s443_s16 = sadd.s32 4294967294, %s687_s14   ;;  %s687_s14 = sphi %s720_s14, %s21_s14   ;;  %s683_s13 = sphi %s718_s13, %s947_s13   ;;  %s679_s12 = sphi %s716_s12, %s946_s12   ;;  %s675_s11 = sphi %s714_s11, %s945_s11   ;;  %s671_s10 = sphi %s712_s10, %s944_s10   ;;  %s667_s9 = sphi %s710_s9, %s943_s9  }
   0x9   : > { %s40_s17 = sadd.s32 1, %s683_s13  ;;  %s55_s18 = sadd.s32 1, %s675_s11 }
   0xa   : > { %p42_p0 = scmp.ge.s32.totalorder %s40_s17, 2  ;;  %p62_p1 = scmp.ne.s32.totalorder %s675_s11, %s671_s10 }
   0xb   : > { %p63_p2 = scmp.eq.s32.totalorder %s687_s14, 0  ;;  %p68_p3 = scmp.ne.s32.totalorder %s671_s10, %s667_s9 }
   0xc   : > { %s949_s17 = smov (%p42_p0, %s40_s17), 0  ;;  %p69_p5 = scmp.eq.s32.totalorder %s442_s15, 0 }
   0xd   : > { %p751_p4 = por %p63_p2, %p62_p1  ;;  %s50_s20 = ssub.s32 %s683_s13, %s949_s17 }
   0xe   : > { %p128_p6 = scmp.eq.s32.totalorder %s442_s15, 1  ;;  %p53_p7 = scmp.eq.s32.totalorder %s50_s20, 0 }
   0xf   : > { %p757_p8 = por %p69_p5, %p68_p3  ;;  %p134_p10 = scmp.eq.s32.totalorder %s443_s16, 1 }
  0x10   : > { %p761_p9 = por %p128_p6, %p62_p1  ;;  %p478_p13 = scmp.lt.s32.totalorder %s687_s14, 2 }
  0x11   : > { %s932_s21 = scalar_select %p757_p8, 1, 0 }
  0x12   : > { %s933_s22 = scalar_select %p761_p9, 1, 0 }
  0x13   : > { %s766_s23 = scalar_select %p53_p7, %s675_s11, %s55_s18  }
  0x14   : > { %p768_p11 = por %p134_p10, %p68_p3  ;;  %s775_s25 = sand.u32 1, %s675_s11  }
  0x15   : > { %s446_s26 = sshll.u32 %s775_s25, 3  ;;  %s460_s27 = sshll.u32 %s683_s13, 7 }
  0x16   : > { %s934_s24 = scalar_select %p768_p11, 1, 0 }
  0x17   : > { %s782_s30 = scalar_lea.hbm %s926_s0, %s460_s27  ;;  %s158_s3 = scalar_lea.vmem [#allocation3], %s446_s26 }
  0x18   : > { %s169_s4 = sshll.u32 %s158_s3, 4  ;;  %p788_p0 = pnand %p478_p13, %p751_p4  ;;  %s784_s4 = int_to_ptr.vmem [resolvable:$true] %s169_s4 }
  0x19   : > { %s155_s6 = scalar_lea.sflag [#allocation4], %s775_s25  ;;  %s541_s7 = scalar_lea.hbm %s782_s30, 128 }
  0x1a   : > { %p542_p2 = scmp.ne.s32.totalorder %s782_s30, %s541_s7  ;;  %p543_p3 = pneg %p788_p0 }
  0x1b   : > { %s546_s16 = scalar_lea.hbm %s926_s0, 256  ;;  %p547_p4 = scmp.lt.u32.totalorder %s782_s30, %s926_s0 }
  0x1c   : > { %p544_p5 = pnand %p543_p3, %p542_p2  ;;  %p548_p7 = scmp.lt.u32.totalorder %s546_s16, %s541_s7 }
  0x1d   : > { %p550_p13 = scmp.lt.u32.totalorder %s541_s7, %s782_s30 }
  0x1e   : > { %p545_p6 = pneg %p544_p5  ;;  %p549_p10 = por %p548_p7, %p547_p4 }
  0x20   : > { %p551_p12 = por %p550_p13, %p549_p10 }
  0x22   : > { %p552_p1 = pnand %p551_p12, %p545_p6 }
  0x24   : > { %555 = shalt.err (!%p552_p1)
}
  0x25   : > { %s556_s20 = scalar_lea.vmem %s784_s4, 128  ;;  %s689_s26 = smov [#allocation3]  }
  0x26   : > { %p557_p2 = scmp.ne.s32.totalorder %s784_s4, %s556_s20  ;;  %s561_s27 = sshll.u32 %s689_s26, 4  ;;  %s562_s27 = int_to_ptr.vmem [resolvable:$false] %s561_s27 }
  0x27   : > { %s563_s28 = scalar_lea.vmem %s562_s27, 256  ;;  %p564_p9 = scmp.lt.s32.totalorder %s784_s4, %s562_s27 }
  0x28   : > { %p559_p5 = pnand %p557_p2, %p543_p3  ;;  %p565_p4 = scmp.lt.s32.totalorder %s563_s28, %s556_s20 }
  0x2a   : > { %p560_p11 = pneg %p559_p5  ;;  %p566_p7 = por %p565_p4, %p564_p9 }
  0x2c   : > { %p567_p10 = pnand %p566_p7, %p560_p11 }
  0x2e   : > { %570 = shalt.err (!%p567_p10)
}
  0x2f   : > { %s690_s29 = smov 32   ;;  %s691_s3 = smov 2  }
  0x30   : > { %470 = dma.hbm_to_vmem [thread:$0]  (!%p788_p0), %s782_s30, 128, %s784_s4, %s155_s6, %s690_s29, %s690_s29, %s691_s3  }
  0x31   : > { %p199_p12 = scmp.lt.s32.totalorder %s687_s14, 3  ;;  %s449_s7 = sshll.u32 %s775_s25, 1 }
  0x32   : > { %s450_s8 = sshll.u32 %s683_s13, 5  ;;  %p936_p9 = scmp.ge.s32.totalorder %s687_s14, 1 }
  0x33   : > { %s833_s19 = scalar_lea.hbm %s927_s1, %s450_s8  ;;  %s183_s20 = scalar_lea.vmem [#allocation6], %s449_s7 }
  0x34   : > { %p826_p11 = pnand %p936_p9, %p199_p12  ;;  %s194_s26 = sshll.u32 %s183_s20, 4  ;;  %s195_s26 = int_to_ptr.vmem [resolvable:$true] %s194_s26 }
  0x35   : > { %s180_s30 = scalar_lea.sflag [#allocation7], %s775_s25  ;;  %s571_s4 = scalar_lea.hbm %s833_s19, 32 }
  0x36   : > { %s937_s15 = scalar_select %p826_p11, 1, 0 }
  0x37   : > { %p572_p1 = scmp.ne.s32.totalorder %s833_s19, %s571_s4  ;;  %s576_s28 = scalar_lea.hbm %s927_s1, 64 }
  0x38   : > { %p577_p2 = scmp.lt.u32.totalorder %s833_s19, %s927_s1  ;;  %p578_p5 = scmp.lt.u32.totalorder %s576_s28, %s571_s4 }
  0x39   : > { %p574_p6 = pnand %p572_p1, %p543_p3  ;;  %p580_p7 = scmp.lt.u32.totalorder %s571_s4, %s833_s19 }
  0x3a   : > { %p579_p4 = por %p578_p5, %p577_p2 }
  0x3b   : > { %p575_p13 = pneg %p574_p6 }
  0x3c   : > { %p581_p10 = por %p580_p7, %p579_p4 }
  0x3e   : > { %p582_p12 = pnand %p581_p10, %p575_p13 }
  0x40   : > { %585 = shalt.err (!%p582_p12)
}
  0x41   : > { %s586_s25 = scalar_lea.vmem %s195_s26, 32  ;;  %s692_s7 = smov [#allocation6]  }
  0x42   : > { %p587_p9 = scmp.ne.s32.totalorder %s195_s26, %s586_s25  ;;  %s591_s8 = sshll.u32 %s692_s7, 4  ;;  %s592_s8 = int_to_ptr.vmem [resolvable:$false] %s591_s8 }
  0x43   : > { %s593_s16 = scalar_lea.vmem %s592_s8, 64  ;;  %p594_p8 = scmp.lt.s32.totalorder %s195_s26, %s592_s8 }
  0x44   : > { %p589_p1 = pnand %p587_p9, %p543_p3  ;;  %p595_p11 = scmp.lt.s32.totalorder %s593_s16, %s586_s25 }
  0x46   : > { %p590_p6 = pneg %p589_p1  ;;  %p596_p2 = por %p595_p11, %p594_p8 }
  0x48   : > { %p597_p5 = pnand %p596_p2, %p590_p6 }
  0x4a   : > { %600 = shalt.err (!%p597_p5)
}
  0x4b   : > { %473 = dma.hbm_to_vmem [thread:$0]  (!%p788_p0), %s833_s19, 32, %s195_s26, %s180_s30  }
  0x4c   : > { %p938_p13 = scmp.ne.s32.totalorder %s937_s15, 0 }
  0x4d   : > { %s858_s18 = sand.u32 (!%p938_p13), 1, %s671_s10   ;;  %p939_p3 = scmp.ne.s32.totalorder (!%p938_p13), %s932_s21, 0 }
  0x4e   : > { %203 = sbr.rel (%p938_p13) target bundleno = 173 (0xad), region = 28  ;;  %s452_s20 = sshll.u32 (!%p938_p13), %s858_s18, 3 }
  0x4f   : > { %s206_s4 = scalar_lea.sflag (!%p938_p13), [#allocation4], %s858_s18  ;;  %s209_s6 = scalar_lea.vmem (!%p938_p13), [#allocation3], %s452_s20 }
  0x55   : > { %654 = dma.done.wait (%p939_p3), %s206_s4, 128  }
  0x56   : > { %656 = vsyncadd (%p939_p3), %s206_s4, 4294967168  ;;  %s453_s5 = sshll.u32 %s858_s18, 1  ;;  %s215_s15 = scalar_lea.sflag [#allocation7], %s858_s18 }
  0x57   : > { %s218_s19 = scalar_lea.vmem [#allocation6], %s453_s5 }
  0x58   : > { %658 = dma.done.wait (%p939_p3), %s215_s15, 32  }
  0x59   : > { %660 = vsyncadd (%p939_p3), %s215_s15, 4294967264  ;;  %v693_v0 = vmov 0.0   ;;  %v266_v1 = vld [vmem:[%s209_s6] sm:$0x3]  ;;  %v454_v2 = vld [vmem:[%s209_s6 + $0x2] sm:$0x3]  ;;  %v256_v23 = vlaneseq }
  0x5a   : > { %253 = vst [vmem:[#allocation2] sm:$0x3] %v693_v0  ;;  %v271_v3 = vmax.f32 %v266_v1, %v454_v2  ;;  %v455_v4 = vld [vmem:[%s209_s6 + $0x4] sm:$0x3]  ;;  %v456_v5 = vld [vmem:[%s209_s6 + $0x6] sm:$0x3] }
  0x5b   : > { %v265_v19 = vld [vmem:[%s218_s19] sm:$0x3]  ;;  %v257_v27 = vshrl.u32 %v256_v23, 7  ;;  %v259_v30 = vand.u32 127, %v256_v23  ;;  %vm315_vm5 = vcmask 1041408   ;;  %s242_s21 = scalar_lea.vmem [#allocation8], %s858_s18 }
  0x5c   : > { %v277_v6 = vmax.f32 %v271_v3, %v455_v4  ;;  %vm267_vm0 = vcmp.eq.s32.totalorder %v265_v19, 0  ;;  %vm272_vm1 = vcmp.eq.s32.totalorder %v265_v19, 1  ;;  %vm278_vm2 = vcmp.eq.s32.totalorder %v265_v19, 2  ;;  %s338_s26 = sshll.u32 %s242_s21, 4  ;;  %s457_s30 = sshll.u32 %s679_s12, 4  ;;  %s874_s26 = int_to_ptr.vmem [resolvable:$true] %s338_s26 }
  0x5d   : > { %v268_v25 = vsel %vm267_vm0, %v266_v1, 0.0  ;;  %v273_v26 = vsel %vm272_vm1, %v454_v2, 0.0  ;;  %v279_v29 = vsel %vm278_vm2, %v455_v4, 0.0  ;;  %vm284_vm3 = vcmp.eq.s32.totalorder %v265_v19, 3  ;;  %s879_s29 = scalar_lea.hbm %s928_s2, %s457_s30  ;;  %s325_s3 = scalar_lea.sflag [#allocation5], %s858_s18 }
  0x5e   : > { %v283_v7 = vmax.f32 %v277_v6, %v456_v5  ;;  %v274_v28 = vadd.f32 %v273_v26, %v268_v25  ;;  %v262_v31 = vmul.u32 128, %v257_v27  ;;  %v285_v33 = vsel %vm284_vm3, %v456_v5, 0.0  ;;  %s601_s25 = scalar_lea.vmem %s874_s26, 16  ;;  %p940_p0 = scmp.ne.s32.totalorder %s933_s22, 0 }
  0x5f   : > { %p602_p8 = scmp.ne.s32.totalorder %s874_s26, %s601_s25  ;;  %s694_s12 = smov [#allocation8]  }
  0x60   : > { %v287_v8 = vsub.f32 %v266_v1, %v283_v7  ;;  %v291_v9 = vsub.f32 %v454_v2, %v283_v7  ;;  %v295_v10 = vsub.f32 %v455_v4, %v283_v7  ;;  %v299_v11 = vsub.f32 %v456_v5, %v283_v7  ;;  %s605_s7 = sshll.u32 %s694_s12, 4  ;;  %s606_s7 = int_to_ptr.vmem [resolvable:$false] %s605_s7 }
  0x61   : > { %v280_v32 = vadd.f32 %v279_v29, %v274_v28  ;;  %v263_v35 = vadd.s32 %v262_v31, %v259_v30  ;;  %v306_v39 = vld [vmem:[#allocation2] sm:$0x3]  ;;  %p603_p11 = pnand %p602_p8, %p940_p0  ;;  %s607_s8 = scalar_lea.vmem %s606_s7, 32 }
  0x62   : > { %v288_v12 = vmul.f32 1.442695, %v287_v8  ;;  %v292_v13 = vmul.f32 1.442695, %v291_v9  ;;  %v296_v14 = vmul.f32 1.442695, %v295_v10  ;;  %p608_p7 = scmp.lt.s32.totalorder %s874_s26, %s606_s7  ;;  %p609_p10 = scmp.lt.s32.totalorder %s607_s8, %s601_s25 }
  0x63   : > { %v300_v15 = vmul.f32 1.442695, %v299_v11  ;;  %v286_v36 = vadd.f32 %v285_v33, %v280_v32  ;;  %vm264_vm4 = vcmp.lt.s32.totalorder %v263_v35, 256  ;;  %p604_p4 = pneg %p603_p11 }
  0x64   : > { %531 = vpow2.f32 %v288_v12  ;;  %p610_p12 = por %p609_p10, %p608_p7 }
  0x65   : > { %533 = vpow2.f32 %v292_v13 }
  0x66   : > { %535 = vpow2.f32 %v296_v14  ;;  %p611_p9 = pnand %p610_p12, %p604_p4 }
  0x67   : > { %537 = vpow2.f32 %v300_v15 }
  0x6e   : > { %v532_v16 = vpop.eup %531 }
  0x6f   : > { %v534_v17 = vpop.eup %533 }
  0x70   : > { %v536_v18 = vpop.eup %535  ;;  %v294_v20 = vadd.f32 %v534_v17, %v532_v16 }
  0x71   : > { %v538_v21 = vpop.eup %537 }
  0x72   : > { %v298_v22 = vadd.f32 %v536_v18, %v294_v20 }
  0x74   : > { %v302_v24 = vadd.f32 %v538_v21, %v298_v22 }
  0x76   : > { %539 = vlog2.f32 %v302_v24 }
  0x80   : > { %v540_v34 = vpop.eup %539 }
  0x81   : > { %v304_v37 = vmul.f32 0.6931472, %v540_v34 }
  0x83   : > { %v305_v38 = vadd.f32 %v304_v37, %v283_v7 }
  0x85   : > { %v307_v40 = vsub.f32 %v305_v38, %v286_v36 }
  0x87   : > { %v308_v41 = vsel %vm264_vm4, %v307_v40, 0.0 }
  0x88   : > { %v309_v42 = vadd.f32 %v308_v41, %v306_v39 }
  0x8a   : > { %310 = vst [vmem:[#allocation2] sm:$0x3] %v309_v42 }
  0x91   : > { %v314_v43 = vld [vmem:[#allocation2] sm:$0x3] }
  0x92   : > { %v316_v44 = vsel %vm315_vm5, %v314_v43, 0.0 }
  0x93   : > { %v317_v45 = vrot.slane %v316_v44, 4 }
  0x95   : > { %v318_v46 = vadd.f32 %v317_v45, %v316_v44 }
  0x97   : > { %v319_v47 = vrot.slane %v318_v46, 2 }
  0x99   : > { %v320_v48 = vadd.f32 %v319_v47, %v318_v46 }
  0x9b   : > { %v321_v49 = vrot.slane %v320_v48, 1 }
  0x9d   : > { %v322_v50 = vadd.f32 %v321_v49, %v320_v48 }
  0x9f   : > { %323 = vst [vmem:[%s242_s21] sm:$0x1] %v322_v50 }
  0xa0   : > { %614 = shalt.err (!%p611_p9)
}
  0xa1   : > { %s615_s16 = scalar_lea.hbm %s879_s29, 16  ;;  %s619_s4 = scalar_lea.hbm %s928_s2, 32 }
  0xa2   : > { %p616_p1 = scmp.ne.s32.totalorder %s879_s29, %s615_s16  ;;  %p620_p5 = scmp.lt.u32.totalorder %s879_s29, %s928_s2 }
  0xa3   : > { %p621_p13 = scmp.lt.u32.totalorder %s619_s4, %s615_s16  ;;  %p623_p8 = scmp.lt.u32.totalorder %s615_s16, %s879_s29 }
  0xa4   : > { %p617_p6 = pnand %p616_p1, %p940_p0 }
  0xa5   : > { %p622_p3 = por %p621_p13, %p620_p5 }
  0xa6   : > { %p618_p2 = pneg %p617_p6 }
  0xa7   : > { %p624_p11 = por %p623_p8, %p622_p3 }
  0xa9   : > { %p625_p4 = pnand %p624_p11, %p618_p2 }
  0xab   : > { %628 = shalt.err (!%p625_p4)
}
  0xac   : > { %465 = dma.vmem_to_hbm [thread:$0]  (%p940_p0), %s874_s26, 16, %s879_s29, %s325_s3  }
  0xad PF: > { %s350_s15 = sand.u32 1, %s667_s9   ;;  %p941_p7 = scmp.ne.s32.totalorder %s934_s24, 0 }
  0xae   : > { %p942_p10 = scmp.ge.s32.totalorder %s687_s14, 2  ;;  %s351_s19 = scalar_lea.sflag [#allocation5], %s350_s15 }
  0xb0   : > { %p475_p12 = pnand %p942_p10, %p941_p7 }
  0xb2   : > { %662 = dma.done.wait (!%p475_p12), %s351_s19, 16  }
  0xb3   : > { %664 = vsyncadd (!%p475_p12), %s351_s19, 4294967280  ;;  %s21_s14 = sadd.s32 1, %s687_s14   ;;  %s943_s9 = smov %s671_s10 }
  0xb4   : > { %p18_p9 = scmp.ge.s32.totalorder %s21_s14, 4   ;;  %s944_s10 = smov %s675_s11 }
  0xb5   : > { %s945_s11 = smov %s766_s23  ;;  %s946_s12 = smov %s683_s13 }
  0xb6   : > { %s947_s13 = smov %s949_s17  ;;  %20 = sbr.rel (!%p18_p9) target bundleno = 8 (0x8), region = 97 }
  0xbd   :  { %355 = vsyncpa [#allocation4], 1 }
  0xbe   :  { %357 = vsyncpa [#allocation4 + $0x1], 1 }
  0xbf   :  { %358 = vsyncpa [#allocation7], 1 }
  0xc0   :  { %360 = vsyncpa [#allocation7 + $0x1], 1 }
  0xc1   :  { %361 = vsyncpa [#allocation5], 1 }
  0xc2   :  { %363 = vsyncpa [#allocation5 + $0x1], 1 }

</bundles_post_ra>
